<compile_context>
chip_gen: v6e
topology: v6e:2x2x1
jax: 0.10.0
libtpu: 0.0.40
codegen_flags: <defaults>
</compile_context>

<pallas_src>
import numpy as np
import jax
import jax.numpy as jnp
from jax.experimental import pallas as pl
from jax.experimental.pallas import tpu as pltpu

_NUM_POOL_ROWS = 21  # 1 (global) + 4 (2x2) + 16 (4x4)


def _build_pool_matrix_t(H, W):
    """(HW, 21) matrix; column k averages its pooling region (1/area baked in).

    Col 0              -> AdaptiveAvgPool2d(1)
    Cols 1..4  (a*2+b) -> AdaptiveAvgPool2d(2)
    Cols 5..20 (i*4+j) -> AdaptiveAvgPool2d(4)
    Pixel index p = h * W + w matches x.reshape(B*C, H*W) (NCHW row-major).
    """
    HW = H * W
    P = np.zeros((_NUM_POOL_ROWS, HW), dtype=np.float32)
    P[0, :] = 1.0 / HW
    for k, base in ((2, 1), (4, 5)):
        bh, bw = H // k, W // k
        for i in range(k):
            for j in range(k):
                m = np.zeros((H, W), dtype=np.float32)
                m[i * bh:(i + 1) * bh, j * bw:(j + 1) * bw] = 1.0 / (bh * bw)
                P[base + i * k + j] = m.reshape(HW)
    return jnp.asarray(P.T)  # (HW, 21), f32


def _spp_pool_kernel(pt_ref, x_ref, o_ref):
    # pt_ref: (HW, 21) pooling matrix; x_ref: (rt, HW); o_ref: (rt, 21).
    # MXU matmul with f32 accumulation; no dtype cast on x (bf16 would feed
    # the MXU natively, halving HBM traffic, while P stays f32).
    o_ref[...] = jnp.dot(x_ref[...], pt_ref[...],
                         preferred_element_type=jnp.float32).astype(o_ref.dtype)


def _choose_row_tile(rows, HW, itemsize, target_bytes=8 << 20):
    """Pick the row-tile (sublane axis) size for the flattened (B*C, HW) input.

    Must be a multiple of 8 or equal the full row extent. Targets ~8 MiB input
    slabs so 2x double-buffered tiles stay well inside v7x's 64 MiB VMEM while
    keeping grid steps few and fat (mem-bound kernel: biggest tile that fits).
    """
    if rows * HW * itemsize <= target_bytes:
        return rows                      # whole input in one block (full dim is legal)
    rt = (target_bytes // (HW * itemsize)) // 8 * 8
    rt = max(8, rt)
    return min(rt, rows)


def spp_module_forward(x):
    """Pallas implementation of the (visible) SPPModule.forward: returns (x1, x2, x3)."""
    B, C, H, W = x.shape
    assert H % 4 == 0 and W % 4 == 0, "adaptive pools assume H, W divisible by 4"
    HW = H * W
    rows = B * C

    # Free, contiguous flatten: (B, C, H, W) -> (B*C, H*W). No HBM transpose.
    x_flat = x.reshape(rows, HW)
    pool_t = _build_pool_matrix_t(H, W)           # (HW, 21) f32 constant

    itemsize = jnp.dtype(x.dtype).itemsize
    rt = _choose_row_tile(rows, HW, itemsize)
    n_blocks = pl.cdiv(rows, rt)

    # Explicit scoped-VMEM budget: 2x double-buffered input tile + 2x pool
    # matrix + 2x output tile + headroom, clamped to stay v7x-safe (<= ~48 MiB).
    vmem_need = (2 * rt * HW * itemsize
                 + 2 * HW * _NUM_POOL_ROWS * 4
                 + 2 * rt * _NUM_POOL_ROWS * itemsize
                 + (2 << 20))
    vmem_limit = int(min(max(vmem_need, 24 << 20), 48 << 20))

    cost = pl.CostEstimate(
        flops=2 * rows * HW * _NUM_POOL_ROWS,
        transcendentals=0,
        bytes_accessed=(rows * HW + rows * _NUM_POOL_ROWS) * itemsize
                       + HW * _NUM_POOL_ROWS * 4,
    )

    out = pl.pallas_call(
        _spp_pool_kernel,
        out_shape=jax.ShapeDtypeStruct((rows, _NUM_POOL_ROWS), x.dtype),
        grid=(n_blocks,),
        in_specs=[
            pl.BlockSpec((HW, _NUM_POOL_ROWS), lambda i: (0, 0)),  # pool matrix (resident)
            pl.BlockSpec((rt, HW), lambda i: (i, 0)),              # contiguous input tile
        ],
        out_specs=pl.BlockSpec((rt, _NUM_POOL_ROWS), lambda i: (i, 0)),
        compiler_params=pltpu.CompilerParams(
            dimension_semantics=("parallel",),
            vmem_limit_bytes=vmem_limit),
        cost_estimate=cost,
    )(pool_t, x_flat)

    # Pure reshapes (no transposes) back to torch's NCHW pooled shapes.
    pooled = out.reshape(B, C, _NUM_POOL_ROWS)
    x1 = pooled[:, :, 0:1].reshape(B, C, 1, 1)
    x2 = pooled[:, :, 1:5].reshape(B, C, 2, 2)
    x3 = pooled[:, :, 5:21].reshape(B, C, 4, 4)
    return x1, x2, x3


def _reference_pools(x):
    """Pure-JAX reference for the three adaptive average pools (NCHW)."""
    B, C, H, W = x.shape

    def pool(k):
        xr = x.reshape(B, C, k, H // k, k, W // k)
        return xr.mean(axis=(3, 5))

    return pool(1), pool(2), pool(4)


if __name__ == "__main__":
    key = jax.random.PRNGKey(0)
    B, C, H, W = 2, 4, 16, 16
    kx, kw = jax.random.split(key)
    x = jax.random.normal(kx, (B, C, H, W), dtype=jnp.float32)

    # Deterministic parameter init mirroring SPPModule.__init__ (unused — see TODO above).
    conv_w = (jax.random.normal(kw, (C, 3 * C, 1, 1), dtype=jnp.float32)
              * (1.0 / jnp.sqrt(3.0 * C)))
    bn_gamma = jnp.ones((C,), jnp.float32)
    bn_beta = jnp.zeros((C,), jnp.float32)
    bn_mean = jnp.zeros((C,), jnp.float32)
    bn_var = jnp.ones((C,), jnp.float32)

    x1, x2, x3 = jax.block_until_ready(spp_module_forward(x))

    r1, r2, r3 = _reference_pools(x)
    assert x1.shape == (B, C, 1, 1) and x2.shape == (B, C, 2, 2) and x3.shape == (B, C, 4, 4)
    assert jnp.allclose(x1, r1, atol=1e-5, rtol=1e-5)
    assert jnp.allclose(x2, r2, atol=1e-5, rtol=1e-5)
    assert jnp.allclose(x3, r3, atol=1e-5, rtol=1e-5)

    print("KERNEL_OK")
</pallas_src>

<mosaic_0001>
module attributes {stable_mosaic.version = 11 : i64} {
  func.func @_spp_pool_kernel(%arg0: i32, %arg1: memref<256x21xf32, #tpu.memory_space<vmem>>, %arg2: memref<8x256xf32, #tpu.memory_space<vmem>>, %arg3: memref<8x21xf32, #tpu.memory_space<vmem>>) attributes {dimension_semantics = [#tpu.dimension_semantics<parallel>], iteration_bounds = array<i64: 1>, scalar_prefetch = 0 : i64, scratch_operands = 0 : i64, tpu.core_type = #tpu.core_type<tc>, window_params = [{pipeline_mode = #tpu.pipeline_mode<synchronous>, transform_indices = @transform_0, window_bounds = array<i64: 256, 21>}, {transform_indices = @transform_1, window_bounds = array<i64: 8, 256>}, {transform_indices = @transform_2, window_bounds = array<i64: 8, 21>}]} {
    %c0 = arith.constant 0 : index
    %c0_0 = arith.constant 0 : index
    %0 = vector.load %arg2[%c0, %c0_0] : memref<8x256xf32, #tpu.memory_space<vmem>>, vector<8x256xf32>
    %c0_1 = arith.constant 0 : index
    %c0_2 = arith.constant 0 : index
    %1 = vector.load %arg1[%c0_1, %c0_2] : memref<256x21xf32, #tpu.memory_space<vmem>>, vector<256x21xf32>
    %cst = arith.constant dense<0.000000e+00> : vector<8x21xf32>
    %2 = tpu.matmul %0, %1, %cst {dimension_numbers = #tpu.dot_dimension_numbers<[1], [0], [0], [1], [0, 0, 1, 1], [], []>} : vector<8x256xf32>, vector<256x21xf32>, vector<8x21xf32> -> vector<8x21xf32>
    %c0_3 = arith.constant 0 : index
    %c0_4 = arith.constant 0 : index
    %3 = vector.load %arg3[%c0_3, %c0_4] : memref<8x21xf32, #tpu.memory_space<vmem>>, vector<8x21xf32>
    tpu.vector_store %arg3[%c0_3, %c0_4], %2 {strides = array<i32>} : memref<8x21xf32, #tpu.memory_space<vmem>>, vector<8x21xf32>,
    return
  }
  func.func @transform_0(%arg0: i32) -> (i32, i32) {
    %c0_i32 = arith.constant 0 : i32
    %c0_i32_0 = arith.constant 0 : i32
    %c0_i32_1 = arith.constant 0 : i32
    return %c0_i32, %c0_i32_0 : i32, i32
  }
  func.func @transform_1(%arg0: i32) -> (i32, i32) {
    %c0_i32 = arith.constant 0 : i32
    %c0_i32_0 = arith.constant 0 : i32
    return %arg0, %c0_i32 : i32, i32
  }
  func.func @transform_2(%arg0: i32) -> (i32, i32) {
    %c0_i32 = arith.constant 0 : i32
    %c0_i32_0 = arith.constant 0 : i32
    return %arg0, %c0_i32 : i32, i32
  }
}

</mosaic_0001>

<bundles_post_ra>
// kernel: tpu_custom_call.1
= control target key start
LH: loop header
LB: loop body
LE: loop exit
PB: predicated region body
PF: predicated region fallthrough
CT: control target
= control target key end

     0   :  { %s311_s0 = inlined_call_operand.vmem [shape: f32[256,21], index: 0, kind: input, shape index: {}]   ;;  %s312_s1 = inlined_call_operand.vmem [shape: f32[8,256], index: 1, kind: input, shape index: {}]   ;;  %s313_s2 = inlined_call_operand.hbm [shape: f32[8,21], index: 2, kind: output, shape index: {}]  }
   0x1   :  { %v45_v0 = vld [vmem:[%s311_s0 + $0xf8] sm:$0xff]  ;;  %v44_v2 = vld [vmem:[%s311_s0 + $0xf0] sm:$0xff]  ;;  %v43_v4 = vld [vmem:[%s311_s0 + $0xe8] sm:$0xff] }
   0x2   :  { %v29_v1 = vld [vmem:[%s311_s0 + $0x78] sm:$0xff]  ;;  %132 = vmatprep.subr.mxu0 %v45_v0  ;;  %v28_v3 = vld [vmem:[%s311_s0 + $0x70] sm:$0xff]  ;;  %v27_v5 = vld [vmem:[%s311_s0 + $0x68] sm:$0xff] }
   0x3   :  { %133 = vmatpush3.msra.mxu0 %v29_v1  ;;  %v42_v6 = vld [vmem:[%s311_s0 + $0xe0] sm:$0xff]  ;;  %v41_v8 = vld [vmem:[%s311_s0 + $0xd8] sm:$0xff]  ;;  %v40_v10 = vld [vmem:[%s311_s0 + $0xd0] sm:$0xff] }
   0x4   :  { %134 = vmatprep.subr.mxu0 %v44_v2  ;;  %v26_v7 = vld [vmem:[%s311_s0 + $0x60] sm:$0xff]  ;;  %v25_v9 = vld [vmem:[%s311_s0 + $0x58] sm:$0xff]  ;;  %v24_v11 = vld [vmem:[%s311_s0 + $0x50] sm:$0xff] }
   0x5   :  { %135 = vmatpush3.msra.mxu0 %v28_v3  ;;  %v39_v12 = vld [vmem:[%s311_s0 + $0xc8] sm:$0xff] }
   0x6   :  { %136 = vmatprep.subr.mxu0 %v43_v4  ;;  %v13_v13 = vld [vmem:[%s312_s1 + $0x8] sm:$0xff] }
   0x7   :  { %137 = vmatpush3.msra.mxu0 %v27_v5  ;;  %v23_v14 = vld [vmem:[%s311_s0 + $0x48] sm:$0xff]  ;;  %110 = vmatprep.mubr.f32.mxu0 %v13_v13 }
   0x8   :  { %138 = vmatprep.subr.mxu0 %v42_v6 }
   0x9   :  { %139 = vmatpush3.msra.mxu0 %v26_v7 }
   0xa   :  { %140 = vmatprep.subr.mxu0 %v41_v8 }
   0xb   :  { %141 = vmatpush3.msra.mxu0 %v25_v9 }
   0xc   :  { %142 = vmatprep.subr.mxu0 %v40_v10 }
   0xd   :  { %7 = vsyncpa [#allocation3], 0  ;;  %143 = vmatpush3.msra.mxu0 %v24_v11  ;;  %v38_v15 = vld [vmem:[%s311_s0 + $0xc0] sm:$0xff]  ;;  %v37_v17 = vld [vmem:[%s311_s0 + $0xb8] sm:$0xff]  ;;  %s190_s21 = smov [#allocation2]   ;;  %vm116_vm0 = vcmask 171008  }
   0xe   :  { %144 = vmatprep.subr.mxu0 %v39_v12  ;;  %v22_v16 = vld [vmem:[%s311_s0 + $0x40] sm:$0xff]  ;;  %v21_v18 = vld [vmem:[%s311_s0 + $0x38] sm:$0xff]  ;;  %v36_v19 = vld [vmem:[%s311_s0 + $0xb0] sm:$0xff]  ;;  %s124_s22 = sshll.u32 %s190_s21, 4  ;;  %s125_s22 = int_to_ptr.vmem [resolvable:$true] %s124_s22 }
   0xf   :  { %145 = vmatpush3.msra.mxu0 %v23_v14  ;;  %v20_v20 = vld [vmem:[%s311_s0 + $0x30] sm:$0xff]  ;;  %v35_v21 = vld [vmem:[%s311_s0 + $0xa8] sm:$0xff]  ;;  %v34_v23 = vld [vmem:[%s311_s0 + $0xa0] sm:$0xff]  ;;  %s168_s23 = scalar_lea.vmem %s125_s22, 128  ;;  %p173_p1 = scmp.lt.s32.totalorder %s125_s22, %s125_s22 }
  0x10   :  { %146 = vmatprep.subr.mxu0 %v38_v15  ;;  %v19_v22 = vld [vmem:[%s311_s0 + $0x28] sm:$0xff]  ;;  %v18_v24 = vld [vmem:[%s311_s0 + $0x20] sm:$0xff]  ;;  %v33_v25 = vld [vmem:[%s311_s0 + $0x98] sm:$0xff]  ;;  %p169_p0 = scmp.ne.s32.totalorder %s125_s22, %s168_s23  ;;  %p174_p2 = scmp.lt.s32.totalorder %s168_s23, %s168_s23 }
  0x11   :  { %147 = vmatpush3.msra.mxu0 %v22_v16  ;;  %v17_v26 = vld [vmem:[%s311_s0 + $0x18] sm:$0xff]  ;;  %v32_v27 = vld [vmem:[%s311_s0 + $0x90] sm:$0xff]  ;;  %v31_v29 = vld [vmem:[%s311_s0 + $0x88] sm:$0xff] }
  0x12   :  { %148 = vmatprep.subr.mxu0 %v37_v17  ;;  %v16_v28 = vld [vmem:[%s311_s0 + $0x10] sm:$0xff]  ;;  %v15_v30 = vld [vmem:[%s311_s0 + $0x8] sm:$0xff]  ;;  %v30_v31 = vld [vmem:[%s311_s0 + $0x80] sm:$0xff]  ;;  %p175_p3 = por %p174_p2, %p173_p1 }
  0x13   :  { %149 = vmatpush3.msra.mxu0 %v21_v18  ;;  %v14_v32 = vld [vmem:[%s311_s0] sm:$0xff] }
  0x14   :  { %150 = vmatprep.subr.mxu0 %v36_v19  ;;  %v12_v33 = vld [vmem:[%s312_s1] sm:$0xff]  ;;  %p176_p4 = pnand %p175_p3, %p169_p0 }
  0x15   :  { %151 = vmatpush3.msra.mxu0 %v20_v20 }
  0x16   :  { %152 = vmatprep.subr.mxu0 %v35_v21 }
  0x17   :  { %153 = vmatpush3.msra.mxu0 %v19_v22 }
  0x18   :  { %154 = vmatprep.subr.mxu0 %v34_v23 }
  0x19   :  { %155 = vmatpush3.msra.mxu0 %v18_v24 }
  0x1a   :  { %156 = vmatprep.subr.mxu0 %v33_v25 }
  0x1b   :  { %157 = vmatpush3.msra.mxu0 %v17_v26 }
  0x1c   :  { %158 = vmatprep.subr.mxu0 %v32_v27 }
  0x1d   :  { %159 = vmatpush3.msra.mxu0 %v16_v28 }
  0x1e   :  { %160 = vmatprep.subr.mxu0 %v31_v29 }
  0x1f   :  { %161 = vmatpush3.msra.mxu0 %v15_v30 }
  0x20   :  { %162 = vmatprep.subr.mxu0 %v30_v31 }
  0x21   :  { %163 = vmatpush3.msra.mxu0 %v14_v32 }
  0x22   :  { %111 = vmatmul.mubr.f32.vlgmr.msra.gmra.mxu0 %v12_v33 }
  0xe2   :  { %v164_v34 = vpop.f32.mrf.mxu0 }
  0xe4   :  { %v165_v35 = vpop.f32.mrf.mxu0 }
  0xe5   :  { %v166_v36 = vadd.f32 %v165_v35, %v164_v34 }
  0xe7   :  { %117 = vst.msk [vmem:[#allocation2] sm:$0xff] %vm116_vm0, %v166_v36 }
  0xe8   :  { %179 = shalt.err (!%p176_p4)
}
  0xe9   :  { %127 = dma.vmem_to_hbm [thread:$0]  %s125_s22, 128, %s313_s2, [#allocation3]  }
  0xea   :  { %188 = dma.done.wait [#allocation3], 128  }
  0xeb   :  { %189 = vsyncadd [#allocation3], 4294967168 }
  0xec   :  { %131 = vsyncpa [#allocation3], 1 }

</bundles_post_ra>
